<compile_context>
chip_gen: v7x
topology: tpu7x:2x2x1
jax: 0.10.0
libtpu: 0.0.40
codegen_flags: <defaults>
</compile_context>

<pallas_src>
import functools

import jax
import jax.numpy as jnp
from jax.experimental import pallas as pl
from jax.experimental.pallas import tpu as pltpu


_LANE = 128
_NUM_F32_TEMPS = 6           # conservative count of block-sized f32 intermediates
_FOOTPRINT_FRACTION = 0.70   # fraction of the scoped VMEM limit used for blocks


def _round_up(x, m):
    return ((x + m - 1) // m) * m


def _vmem_limit_bytes():
    """Generation-aware scoped-VMEM limit: ~48 MiB on v7x (64 MiB/TC physical),
    64 MiB on v5e/v6e (128 MiB physical)."""
    cap = None
    try:
        cap = getattr(pltpu.get_tpu_info(), "vmem_capacity_bytes", None)
    except Exception:
        cap = None
    if not cap:
        cap = 64 * 1024 * 1024          # conservative fallback (v7x per-TC VMEM)
    return min(int(cap * 3 // 4), 64 * 1024 * 1024)


def _softmax_parts(s, t, tau, class_axis):
    """Shared student/teacher shifted logits + normalizers, all in f32."""
    inv_tau = 1.0 / float(tau)
    s = s.astype(jnp.float32) * inv_tau
    t = t.astype(jnp.float32) * inv_tau
    t_shift = t - jnp.max(t, axis=class_axis, keepdims=True)
    t_exp = jnp.exp(t_shift)
    t_sum = jnp.sum(t_exp, axis=class_axis, keepdims=True)
    log_t_sum = jnp.log(t_sum)
    s_shift = s - jnp.max(s, axis=class_axis, keepdims=True)
    s_lse = jnp.log(jnp.sum(jnp.exp(s_shift), axis=class_axis, keepdims=True))
    return t_shift, t_exp, t_sum, log_t_sum, s_shift, s_lse


def _kl_kernel_none(s_ref, t_ref, out_ref, *, tau, scale, class_axis):
    t_shift, t_exp, t_sum, log_t_sum, s_shift, s_lse = _softmax_parts(
        s_ref[...], t_ref[...], tau, class_axis)
    p_t = t_exp * pl.reciprocal(t_sum, approx=False)
    # p_t == 0 only on exp() underflow, where the (finite) log difference makes
    # the product exactly 0 as well -> no where-guard needed.
    elem = p_t * ((t_shift - log_t_sum) - (s_shift - s_lse))
    out_ref[...] = (scale * elem).astype(out_ref.dtype)


def _kl_kernel_partial(s_ref, t_ref, out_ref, *, tau, class_axis,
                       pos_axis, pos_grid_axis, tile, total):
    """Per-tile (unscaled) partial sum broadcast over a lane-dense (8,128) block.

    Uses the identity
      sum_c p_t * (log_p_t - log_q_s)
        = sum_c(t_exp * (t_shift - s_shift)) / t_sum + (s_lse - log_t_sum)
    so only one per-position divide is needed (no per-element p_t multiply).
    """
    t_shift, t_exp, t_sum, log_t_sum, s_shift, s_lse = _softmax_parts(
        s_ref[...], t_ref[...], tau, class_axis)
    weighted = jnp.sum(t_exp * (t_shift - s_shift), axis=class_axis, keepdims=True)
    per_pos = weighted * pl.reciprocal(t_sum, approx=False) + (s_lse - log_t_sum)
    if total % tile != 0:                 # static: only ragged shapes pay for the mask
        idx = (pl.program_id(pos_grid_axis) * tile
               + jax.lax.broadcasted_iota(jnp.int32, per_pos.shape, pos_axis))
        per_pos = jnp.where(idx < total, per_pos, 0.0)
    out_ref[...] = jnp.full(out_ref.shape, jnp.sum(per_pos), jnp.float32)


def _plan_units(full_units, unit_bytes, budget_bytes, other_grid_steps):
    """How many (sublane-row / 128-lane) units per block fit the VMEM budget.
    Forces >= 2 total grid steps when splittable so both v7x TCs get work."""
    units = min(full_units, max(1, budget_bytes // max(1, unit_bytes)))
    steps = other_grid_steps * ((full_units + units - 1) // units)
    if steps < 2 and full_units >= 2:
        units = (full_units + 1) // 2
    return units


def kl_divergence(preds_S, preds_T, tau=1.0, reduction="batchmean",
                  loss_weight=1.0, *, budget_bytes=None):
    accept = {"none", "batchmean", "sum", "mean"}
    assert reduction in accept, f"unsupported reduction {reduction}"
    assert preds_S.shape == preds_T.shape
    assert preds_S.ndim in (2, 4), "preds must be (N, C) or (N, C, H, W)"

    tau = float(tau)
    scale = tau * tau * float(loss_weight)
    in_dtype = preds_S.dtype
    itemsize = jnp.dtype(in_dtype).itemsize
    sublane = 8 if itemsize >= 4 else 16          # bf16 sublane packing
    out_none_dtype = in_dtype                     # keep 'none' writeback narrow
    out_itemsize = jnp.dtype(out_none_dtype).itemsize

    vmem_limit = _vmem_limit_bytes()
    budget = (int(vmem_limit * _FOOTPRINT_FRACTION) if budget_bytes is None
              else int(budget_bytes))

    # Per-element padded footprint: 2 inputs x 2 pipeline buffers, in-kernel f32
    # temporaries, plus (for 'none') 2 output buffers.
    per_elem_bytes = (4 * itemsize + 4 * _NUM_F32_TEMPS
                      + (2 * out_itemsize if reduction == "none" else 0))

    def _params(sem):
        return pltpu.CompilerParams(dimension_semantics=sem,
                                    vmem_limit_bytes=vmem_limit)

    if preds_S.ndim == 2:
        rows, c = preds_S.shape
        c_pad = _round_up(c, _LANE)
        unit_bytes = sublane * c_pad * per_elem_bytes
        full_units = pl.cdiv(rows, sublane)
        # TODO(synk): vocab-scale C can exceed VMEM even at one sublane-row unit;
        # a class-axis (online-softmax) split is not implemented.
        units = _plan_units(full_units, unit_bytes, budget, 1)
        tile_r = rows if units >= full_units else units * sublane
        grid = (pl.cdiv(rows, tile_r),)
        in_spec = pl.BlockSpec((tile_r, c), lambda i: (i, 0))
        sem = ("parallel",)

        if reduction == "none":
            return pl.pallas_call(
                functools.partial(_kl_kernel_none, tau=tau, scale=scale,
                                  class_axis=1),
                grid=grid,
                in_specs=[in_spec, in_spec],
                out_specs=pl.BlockSpec((tile_r, c), lambda i: (i, 0)),
                out_shape=jax.ShapeDtypeStruct((rows, c), out_none_dtype),
                compiler_params=_params(sem),
            )(preds_S, preds_T)

        partials = pl.pallas_call(
            functools.partial(_kl_kernel_partial, tau=tau, class_axis=1,
                              pos_axis=0, pos_grid_axis=0,
                              tile=tile_r, total=rows),
            grid=grid,
            in_specs=[in_spec, in_spec],
            out_specs=pl.BlockSpec((1, 8, _LANE), lambda i: (i, 0, 0)),
            out_shape=jax.ShapeDtypeStruct((grid[0], 8, _LANE), jnp.float32),
            compiler_params=_params(sem),
        )(preds_S, preds_T)
        total = jnp.sum(partials[:, 0, 0])
        batch = rows
        numel = rows * c

    else:
        # 4D (N, C, H, W): flatten spatial dims -> (N, C, HW).  Free reshape for
        # contiguous NCHW; lane axis becomes the dense HW axis, softmax stays on
        # the channel (sublane) axis.
        n, c, h, w = preds_S.shape
        hw = h * w
        s3 = preds_S.reshape(n, c, hw)
        t3 = preds_T.reshape(n, c, hw)

        c_pad = _round_up(c, sublane)
        unit_bytes = c_pad * _LANE * per_elem_bytes
        full_units = pl.cdiv(hw, _LANE)
        units = _plan_units(full_units, unit_bytes, budget, n)
        tile_hw = hw if units >= full_units else units * _LANE
        grid_hw = pl.cdiv(hw, tile_hw)
        grid = (n, grid_hw)
        in_spec = pl.BlockSpec((1, c, tile_hw), lambda i, j: (i, 0, j))
        sem = ("parallel", "parallel")

        if reduction == "none":
            out3 = pl.pallas_call(
                functools.partial(_kl_kernel_none, tau=tau, scale=scale,
                                  class_axis=1),
                grid=grid,
                in_specs=[in_spec, in_spec],
                out_specs=pl.BlockSpec((1, c, tile_hw), lambda i, j: (i, 0, j)),
                out_shape=jax.ShapeDtypeStruct((n, c, hw), out_none_dtype),
                compiler_params=_params(sem),
            )(s3, t3)
            return out3.reshape(n, c, h, w)

        partials = pl.pallas_call(
            functools.partial(_kl_kernel_partial, tau=tau, class_axis=1,
                              pos_axis=2, pos_grid_axis=1,
                              tile=tile_hw, total=hw),
            grid=grid,
            in_specs=[in_spec, in_spec],
            out_specs=pl.BlockSpec((1, 1, 8, _LANE), lambda i, j: (i, j, 0, 0)),
            out_shape=jax.ShapeDtypeStruct((n, grid_hw, 8, _LANE), jnp.float32),
            compiler_params=_params(sem),
        )(s3, t3)
        total = jnp.sum(partials[:, :, 0, 0])
        batch = n
        numel = n * c * hw

    if reduction == "batchmean":
        total = total / batch
    elif reduction == "mean":
        total = total / numel
    # 'sum': no extra division.
    return scale * total


class KLDivergence:
    """Thin module-style wrapper matching the PyTorch KLDivergence forward."""

    def __init__(self, tau=1.0, reduction="batchmean", loss_weight=1.0):
        accept = {"none", "batchmean", "sum", "mean"}
        assert reduction in accept
        self.tau = tau
        self.reduction = reduction
        self.loss_weight = loss_weight

    def __call__(self, preds_S, preds_T):
        # preds_T.detach() is a no-op in this forward-only port.
        return kl_divergence(preds_S, preds_T, tau=self.tau,
                             reduction=self.reduction,
                             loss_weight=self.loss_weight)


def _reference(preds_S, preds_T, tau, reduction, loss_weight):
    """Pure-JAX reference matching the PyTorch module (computed in f32)."""
    s = preds_S.astype(jnp.float32)
    t = preds_T.astype(jnp.float32)
    p_t = jax.nn.softmax(t / tau, axis=1)
    log_q = jax.nn.log_softmax(s / tau, axis=1)
    log_p = jax.nn.log_softmax(t / tau, axis=1)
    elem = jnp.where(p_t > 0, p_t * (log_p - log_q), 0.0)
    if reduction == "none":
        loss = elem
    elif reduction == "sum":
        loss = jnp.sum(elem)
    elif reduction == "mean":
        loss = jnp.mean(elem)
    else:  # batchmean
        loss = jnp.sum(elem) / preds_S.shape[0]
    return loss_weight * (tau ** 2) * loss


if __name__ == "__main__":
    key = jax.random.PRNGKey(0)
    tau, loss_weight = 2.0, 0.5

    # (shape, dtype, forced budget_bytes or None, reductions, tolerance)
    cases = [
        ((2, 4, 16, 16), jnp.float32, None,
         ("batchmean", "sum", "mean", "none"), 1e-5),    # 4D, module path
        ((2, 4, 12, 16), jnp.float32, 1024,
         ("batchmean", "none"), 1e-5),                   # 4D, multi-tile + ragged HW
        ((20, 32), jnp.float32, 1024,
         ("sum", "none"), 1e-5),                         # 2D, multi-tile + ragged rows
        ((8, 128), jnp.float32, None, ("mean",), 1e-5),  # 2D logits, single tile
        ((2, 4, 16, 16), jnp.bfloat16, None,
         ("batchmean",), 1e-4),                          # bf16 inputs (sublane=16)
    ]

    for idx, (shape, dtype, bb, reductions, tol) in enumerate(cases):
        ks, kt = jax.random.split(jax.random.fold_in(key, idx))
        s = jax.random.normal(ks, shape, jnp.float32).astype(dtype)
        t = jax.random.normal(kt, shape, jnp.float32).astype(dtype)
        for reduction in reductions:
            if bb is None and idx == 0:
                mod = KLDivergence(tau=tau, reduction=reduction,
                                   loss_weight=loss_weight)
                out = mod(s, t)
            else:
                kwargs = {} if bb is None else {"budget_bytes": bb}
                out = kl_divergence(s, t, tau=tau, reduction=reduction,
                                    loss_weight=loss_weight, **kwargs)
            out = jax.block_until_ready(out)
            ref = _reference(s, t, tau, reduction, loss_weight)
            assert jnp.allclose(jnp.asarray(out, jnp.float32), ref,
                                atol=tol, rtol=tol), \
                (shape, dtype, reduction, out, ref)

    print("KERNEL_OK")
</pallas_src>

<mosaic_0001>
module attributes {stable_mosaic.version = 11 : i64} {
  func.func @_kl_kernel_partial(%arg0: i32, %arg1: i32, %arg2: memref<1x4x256xf32, #tpu.memory_space<vmem>>, %arg3: memref<1x4x256xf32, #tpu.memory_space<vmem>>, %arg4: memref<1x1x8x128xf32, #tpu.memory_space<vmem>>) attributes {dimension_semantics = [#tpu.dimension_semantics<parallel>, #tpu.dimension_semantics<parallel>], iteration_bounds = array<i64: 2, 1>, scalar_prefetch = 0 : i64, scratch_operands = 0 : i64, tpu.core_type = #tpu.core_type<tc>, window_params = [{transform_indices = @transform_0, window_bounds = array<i64: 1, 4, 256>}, {transform_indices = @transform_1, window_bounds = array<i64: 1, 4, 256>}, {transform_indices = @transform_2, window_bounds = array<i64: 1, 1, 8, 128>}]} {
    %c0 = arith.constant 0 : index
    %c0_0 = arith.constant 0 : index
    %c0_1 = arith.constant 0 : index
    %0 = vector.load %arg2[%c0, %c0_0, %c0_1] : memref<1x4x256xf32, #tpu.memory_space<vmem>>, vector<1x4x256xf32>
    %c0_2 = arith.constant 0 : index
    %c0_3 = arith.constant 0 : index
    %c0_4 = arith.constant 0 : index
    %1 = vector.load %arg3[%c0_2, %c0_3, %c0_4] : memref<1x4x256xf32, #tpu.memory_space<vmem>>, vector<1x4x256xf32>
    %cst = arith.constant 5.000000e-01 : f32
    %2 = vector.broadcast %cst : f32 to vector<1x4x256xf32>
    %3 = arith.mulf %0, %2 : vector<1x4x256xf32>
    %cst_5 = arith.constant 5.000000e-01 : f32
    %4 = vector.broadcast %cst_5 : f32 to vector<1x4x256xf32>
    %5 = arith.mulf %1, %4 : vector<1x4x256xf32>
    %cst_6 = arith.constant dense<0xFF800000> : vector<1x256xf32>
    %6 = vector.multi_reduction <maximumf>, %5, %cst_6 [1] : vector<1x4x256xf32> to vector<1x256xf32>
    %7 = vector.shape_cast %6 : vector<1x256xf32> to vector<1x1x256xf32>
    %8 = vector.broadcast %7 : vector<1x1x256xf32> to vector<1x4x256xf32>
    %9 = arith.subf %5, %8 : vector<1x4x256xf32>
    %10 = math.exp %9 : vector<1x4x256xf32>
    %cst_7 = arith.constant dense<0.000000e+00> : vector<1x256xf32>
    %11 = vector.multi_reduction <add>, %10, %cst_7 [1] : vector<1x4x256xf32> to vector<1x256xf32>
    %12 = vector.shape_cast %11 : vector<1x256xf32> to vector<1x1x256xf32>
    %13 = math.log %12 : vector<1x1x256xf32>
    %cst_8 = arith.constant dense<0xFF800000> : vector<1x256xf32>
    %14 = vector.multi_reduction <maximumf>, %3, %cst_8 [1] : vector<1x4x256xf32> to vector<1x256xf32>
    %15 = vector.shape_cast %14 : vector<1x256xf32> to vector<1x1x256xf32>
    %16 = vector.broadcast %15 : vector<1x1x256xf32> to vector<1x4x256xf32>
    %17 = arith.subf %3, %16 : vector<1x4x256xf32>
    %18 = math.exp %17 : vector<1x4x256xf32>
    %cst_9 = arith.constant dense<0.000000e+00> : vector<1x256xf32>
    %19 = vector.multi_reduction <add>, %18, %cst_9 [1] : vector<1x4x256xf32> to vector<1x256xf32>
    %20 = vector.shape_cast %19 : vector<1x256xf32> to vector<1x1x256xf32>
    %21 = math.log %20 : vector<1x1x256xf32>
    %22 = arith.subf %9, %17 : vector<1x4x256xf32>
    %23 = arith.mulf %10, %22 : vector<1x4x256xf32>
    %cst_10 = arith.constant dense<0.000000e+00> : vector<1x256xf32>
    %24 = vector.multi_reduction <add>, %23, %cst_10 [1] : vector<1x4x256xf32> to vector<1x256xf32>
    %25 = vector.shape_cast %24 : vector<1x256xf32> to vector<1x1x256xf32>
    %26 = tpu.reciprocal %12 : vector<1x1x256xf32> -> vector<1x1x256xf32>
    %27 = arith.mulf %25, %26 : vector<1x1x256xf32>
    %28 = arith.subf %21, %13 : vector<1x1x256xf32>
    %29 = arith.addf %27, %28 : vector<1x1x256xf32>
    %30 = vector.shape_cast %29 : vector<1x1x256xf32> to vector<1x1x1x256xf32>
    %cst_11 = arith.constant dense<0.000000e+00> : vector<1xf32>
    %31 = vector.multi_reduction <add>, %30, %cst_11 [1, 2, 3] : vector<1x1x1x256xf32> to vector<1xf32>
    %32 = vector.shape_cast %31 : vector<1xf32> to vector<1x1x1x1xf32>
    %33 = vector.extract %32[0, 0, 0, 0] : f32 from vector<1x1x1x1xf32>
    %34 = vector.broadcast %33 : f32 to vector<1x1x8x128xf32>
    %c0_12 = arith.constant 0 : index
    %c0_13 = arith.constant 0 : index
    %c0_14 = arith.constant 0 : index
    %c0_15 = arith.constant 0 : index
    %35 = vector.load %arg4[%c0_12, %c0_13, %c0_14, %c0_15] : memref<1x1x8x128xf32, #tpu.memory_space<vmem>>, vector<1x1x8x128xf32>
    tpu.vector_store %arg4[%c0_12, %c0_13, %c0_14, %c0_15], %34 {strides = array<i32>} : memref<1x1x8x128xf32, #tpu.memory_space<vmem>>, vector<1x1x8x128xf32>,
    return
  }
  func.func @transform_0(%arg0: i32, %arg1: i32) -> (i32, i32, i32) {
    %c0_i32 = arith.constant 0 : i32
    %c0_i32_0 = arith.constant 0 : i32
    return %arg0, %c0_i32, %arg1 : i32, i32, i32
  }
  func.func @transform_1(%arg0: i32, %arg1: i32) -> (i32, i32, i32) {
    %c0_i32 = arith.constant 0 : i32
    %c0_i32_0 = arith.constant 0 : i32
    return %arg0, %c0_i32, %arg1 : i32, i32, i32
  }
  func.func @transform_2(%arg0: i32, %arg1: i32) -> (i32, i32, i32, i32) {
    %c0_i32 = arith.constant 0 : i32
    %c0_i32_0 = arith.constant 0 : i32
    %c0_i32_1 = arith.constant 0 : i32
    return %arg0, %arg1, %c0_i32, %c0_i32_0 : i32, i32, i32, i32
  }
}

</mosaic_0001>

<bundles_post_ra>
// kernel: tpu_custom_call.1
= control target key start
LH: loop header
LB: loop body
LE: loop exit
PB: predicated region body
PF: predicated region fallthrough
CT: control target
= control target key end

     0   :  { %7 = vsyncpa [#allocation3], 0  ;;  %s988_s0 = inlined_call_operand.hbm [shape: f32[2,4,256], index: 0, kind: input, shape index: {}]   ;;  %s989_s1 = inlined_call_operand.hbm [shape: f32[2,4,256], index: 1, kind: input, shape index: {}]   ;;  %s990_s2 = inlined_call_operand.hbm [shape: f32[2,1,8,128], index: 2, kind: output, shape index: {}]  }
   0x1   :  { %9 = vsyncpa [#allocation3 + $0x1], 0 }
   0x2   :  { %10 = vsyncpa [#allocation6], 0 }
   0x3   :  { %12 = vsyncpa [#allocation6 + $0x1], 0 }
   0x4   :  { %13 = vsyncpa [#allocation4], 0 }
   0x5   :  { %15 = vsyncpa [#allocation4 + $0x1], 0  ;;  %s753_s9 = smov 0   ;;  %s755_s10 = smov 0  }
   0x6   :  { %s757_s11 = smov 0   ;;  %s759_s12 = smov 0  }
   0x7   :  { %s761_s13 = smov 0   ;;  %s763_s14 = smov 0  }
   0x8 LB: > { %s482_s15 = sadd.s32 4294967295, %s733_s14   ;;  %s483_s16 = sadd.s32 4294967294, %s733_s14   ;;  %s733_s14 = sphi %s763_s14, %s21_s14   ;;  %s729_s13 = sphi %s761_s13, %s1010_s13   ;;  %s725_s12 = sphi %s759_s12, %s1009_s12   ;;  %s721_s11 = sphi %s757_s11, %s1008_s11   ;;  %s717_s10 = sphi %s755_s10, %s1007_s10   ;;  %s713_s9 = sphi %s753_s9, %s1006_s9  }
   0x9   : > { %s33_s17 = sadd.s32 1, %s729_s13  ;;  %s42_s18 = sadd.s32 1, %s721_s11 }
   0xa   : > { %p35_p0 = scmp.ge.s32.totalorder %s33_s17, 2  ;;  %p49_p1 = scmp.ne.s32.totalorder %s721_s11, %s717_s10 }
   0xb   : > { %p50_p2 = scmp.eq.s32.totalorder %s733_s14, 0  ;;  %p55_p3 = scmp.ne.s32.totalorder %s717_s10, %s713_s9 }
   0xc   : > { %s1012_s17 = smov (%p35_p0, %s33_s17), 0  ;;  %p56_p5 = scmp.eq.s32.totalorder %s482_s15, 0 }
   0xd   : > { %p794_p4 = por %p50_p2, %p49_p1  ;;  %s37_s20 = ssub.s32 %s729_s13, %s1012_s17 }
   0xe   : > { %p109_p6 = scmp.eq.s32.totalorder %s482_s15, 1  ;;  %p40_p7 = scmp.eq.s32.totalorder %s37_s20, 0 }
   0xf   : > { %p800_p8 = por %p56_p5, %p55_p3  ;;  %p115_p10 = scmp.eq.s32.totalorder %s483_s16, 1 }
  0x10   : > { %p804_p9 = por %p109_p6, %p49_p1  ;;  %p521_p13 = scmp.lt.s32.totalorder %s733_s14, 2 }
  0x11   : > { %s994_s21 = scalar_select %p800_p8, 1, 0 }
  0x12   : > { %s995_s22 = scalar_select %p804_p9, 1, 0 }
  0x13   : > { %s809_s23 = scalar_select %p40_p7, %s721_s11, %s42_s18  }
  0x14   : > { %p811_p11 = por %p115_p10, %p55_p3  ;;  %s818_s25 = sand.u32 1, %s721_s11  }
  0x15   : > { %s486_s26 = sshll.u32 %s818_s25, 3  ;;  %s500_s27 = sshll.u32 %s729_s13, 7 }
  0x16   : > { %s996_s24 = scalar_select %p811_p11, 1, 0 }
  0x17   : > { %s827_s30 = scalar_lea.hbm %s988_s0, %s500_s27  ;;  %s139_s3 = scalar_lea.vmem [#allocation2], %s486_s26 }
  0x18   : > { %s149_s4 = sshll.u32 %s139_s3, 4  ;;  %p835_p0 = pnand %p521_p13, %p794_p4  ;;  %s831_s4 = int_to_ptr.vmem [resolvable:$true] %s149_s4 }
  0x19   : > { %s136_s6 = scalar_lea.sflag [#allocation3], %s818_s25  ;;  %s587_s7 = scalar_lea.hbm %s827_s30, 128 }
  0x1a   : > { %p588_p3 = scmp.ne.s32.totalorder %s827_s30, %s587_s7  ;;  %p589_p5 = pneg %p835_p0 }
  0x1b   : > { %s592_s16 = scalar_lea.hbm %s988_s0, 256  ;;  %p593_p4 = scmp.lt.u32.totalorder %s827_s30, %s988_s0 }
  0x1c   : > { %p590_p6 = pnand %p589_p5, %p588_p3  ;;  %p594_p10 = scmp.lt.u32.totalorder %s592_s16, %s587_s7 }
  0x1d   : > { %p596_p12 = scmp.lt.u32.totalorder %s587_s7, %s827_s30 }
  0x1e   : > { %p591_p7 = pneg %p590_p6  ;;  %p595_p13 = por %p594_p10, %p593_p4 }
  0x20   : > { %p597_p1 = por %p596_p12, %p595_p13 }
  0x22   : > { %p598_p2 = pnand %p597_p1, %p591_p7 }
  0x24   : > { %601 = shalt.err (!%p598_p2)
}
  0x25   : > { %s602_s20 = scalar_lea.vmem %s831_s4, 128  ;;  %s735_s28 = smov [#allocation2]  }
  0x26   : > { %p603_p3 = scmp.ne.s32.totalorder %s831_s4, %s602_s20  ;;  %s607_s29 = sshll.u32 %s735_s28, 4  ;;  %s608_s29 = int_to_ptr.vmem [resolvable:$false] %s607_s29 }
  0x27   : > { %s609_s3 = scalar_lea.vmem %s608_s29, 256  ;;  %p610_p9 = scmp.lt.s32.totalorder %s831_s4, %s608_s29 }
  0x28   : > { %p605_p6 = pnand %p603_p3, %p589_p5  ;;  %p611_p4 = scmp.lt.s32.totalorder %s609_s3, %s602_s20 }
  0x2a   : > { %p606_p11 = pneg %p605_p6  ;;  %p612_p10 = por %p611_p4, %p610_p9 }
  0x2c   : > { %p613_p12 = pnand %p612_p10, %p606_p11 }
  0x2e   : > { %616 = shalt.err (!%p613_p12)
}
  0x2f   : > { %513 = dma.hbm_to_vmem [thread:$0]  (!%p835_p0), %s827_s30, 128, %s831_s4, %s136_s6  }
  0x30   : > { %p998_p1 = scmp.lt.s32.totalorder %s733_s14, 3  ;;  %p999_p2 = scmp.ge.s32.totalorder %s733_s14, 1 }
  0x31   : > { %s880_s16 = scalar_lea.hbm %s989_s1, %s500_s27  ;;  %s160_s18 = scalar_lea.vmem [#allocation5], %s486_s26 }
  0x32   : > { %p871_p7 = pnand %p999_p2, %p998_p1  ;;  %s170_s19 = sshll.u32 %s160_s18, 4  ;;  %s171_s19 = int_to_ptr.vmem [resolvable:$true] %s170_s19 }
  0x33   : > { %s157_s30 = scalar_lea.sflag [#allocation6], %s818_s25  ;;  %s617_s4 = scalar_lea.hbm %s880_s16, 128 }
  0x34   : > { %s1000_s7 = scalar_select %p871_p7, 1, 0 }
  0x35   : > { %p618_p9 = scmp.ne.s32.totalorder %s880_s16, %s617_s4  ;;  %s622_s27 = scalar_lea.hbm %s989_s1, 256 }
  0x36   : > { %p623_p3 = scmp.lt.u32.totalorder %s880_s16, %s989_s1  ;;  %p624_p6 = scmp.lt.u32.totalorder %s622_s27, %s617_s4 }
  0x37   : > { %p620_p11 = pnand %p618_p9, %p589_p5  ;;  %p626_p10 = scmp.lt.u32.totalorder %s617_s4, %s880_s16 }
  0x38   : > { %p625_p4 = por %p624_p6, %p623_p3 }
  0x39   : > { %p621_p13 = pneg %p620_p11 }
  0x3a   : > { %p627_p12 = por %p626_p10, %p625_p4 }
  0x3c   : > { %p628_p1 = pnand %p627_p12, %p621_p13 }
  0x3e   : > { %631 = shalt.err (!%p628_p1)
}
  0x3f   : > { %s632_s25 = scalar_lea.vmem %s171_s19, 128  ;;  %s736_s26 = smov [#allocation5]  }
  0x40   : > { %p633_p2 = scmp.ne.s32.totalorder %s171_s19, %s632_s25  ;;  %s637_s3 = sshll.u32 %s736_s26, 4  ;;  %s638_s3 = int_to_ptr.vmem [resolvable:$false] %s637_s3 }
  0x41   : > { %s639_s8 = scalar_lea.vmem %s638_s3, 256  ;;  %p640_p8 = scmp.lt.s32.totalorder %s171_s19, %s638_s3 }
  0x42   : > { %p635_p9 = pnand %p633_p2, %p589_p5  ;;  %p641_p7 = scmp.lt.s32.totalorder %s639_s8, %s632_s25 }
  0x44   : > { %p636_p11 = pneg %p635_p9  ;;  %p642_p3 = por %p641_p7, %p640_p8 }
  0x46   : > { %p643_p6 = pnand %p642_p3, %p636_p11 }
  0x48   : > { %646 = shalt.err (!%p643_p6)
}
  0x49   : > { %516 = dma.hbm_to_vmem [thread:$0]  (!%p835_p0), %s880_s16, 128, %s171_s19, %s157_s30  }
  0x4a   : > { %p1001_p13 = scmp.ne.s32.totalorder %s1000_s7, 0 }
  0x4b   : > { %s907_s15 = sand.u32 (!%p1001_p13), 1, %s717_s10   ;;  %p1002_p8 = scmp.ne.s32.totalorder (!%p1001_p13), %s994_s21, 0 }
  0x4c   : > { %179 = sbr.rel (%p1001_p13) target bundleno = 376 (0x178), region = 28  ;;  %s910_s18 = sshll.u32 (!%p1001_p13), %s907_s15, 3 }
  0x4d   : > { %s182_s4 = scalar_lea.sflag (!%p1001_p13), [#allocation3], %s907_s15  ;;  %s185_s6 = scalar_lea.vmem (!%p1001_p13), [#allocation2], %s910_s18 }
  0x53   : > { %700 = dma.done.wait (%p1002_p8), %s182_s4, 128  }
  0x54   : > { %702 = vsyncadd (%p1002_p8), %s182_s4, 4294967168  ;;  %s191_s5 = scalar_lea.sflag [#allocation6], %s907_s15  ;;  %s194_s7 = scalar_lea.vmem [#allocation5], %s910_s18 }
  0x55   : > { %704 = dma.done.wait (%p1002_p8), %s191_s5, 128  }
  0x56   : > { %706 = vsyncadd (%p1002_p8), %s191_s5, 4294967168  ;;  %v222_v0 = vld [vmem:[%s185_s6] sm:$0xff]  ;;  %v223_v1 = vld [vmem:[%s194_s7] sm:$0xff]  ;;  %vm229_vm0 = vcmask 1043456   ;;  %vm344_vm1 = vcmask 1040384   ;;  %s219_s21 = scalar_lea.vmem [#allocation7], %s910_s18 }
  0x57   : > { %v224_v2 = vmul.f32 0.5, %v222_v0  ;;  %v225_v3 = vmul.f32 0.5, %v223_v1  ;;  %s374_s16 = sshll.u32 %s219_s21, 4  ;;  %s497_s19 = sshll.u32 %s725_s12, 7  ;;  %s936_s16 = int_to_ptr.vmem [resolvable:$true] %s374_s16 }
  0x58   : > { %s941_s28 = scalar_lea.hbm %s990_s2, %s497_s19  ;;  %s360_s29 = scalar_lea.sflag [#allocation4], %s907_s15 }
  0x59   : > { %v227_v4 = vcombine.high %v225_v3, %v225_v3  ;;  %v230_v5 = vsel %vm229_vm0, %v225_v3, -inf  ;;  %v273_v6 = vcombine.high %v224_v2, %v224_v2  ;;  %v275_v7 = vsel %vm229_vm0, %v224_v2, -inf  ;;  %s647_s25 = scalar_lea.vmem %s936_s16, 128  ;;  %p1003_p5 = scmp.ne.s32.totalorder %s995_s22, 0 }
  0x5a   : > { %v231_v8 = vrot.slane %v230_v5, 4  ;;  %v276_v9 = vrot.slane %v275_v7, 4  ;;  %p648_p0 = scmp.ne.s32.totalorder %s936_s16, %s647_s25  ;;  %s737_s12 = smov [#allocation7]  }
  0x5b   : > { %v237_v10 = vsel %vm229_vm0, %v227_v4, -inf  ;;  %v282_v11 = vsel %vm229_vm0, %v273_v6, -inf  ;;  %s651_s26 = sshll.u32 %s737_s12, 4  ;;  %s652_s26 = int_to_ptr.vmem [resolvable:$false] %s651_s26 }
  0x5c   : > { %v232_v12 = vmax.f32 %v230_v5, %v231_v8  ;;  %v238_v13 = vrot.slane %v237_v10, 4  ;;  %v277_v14 = vmax.f32 %v275_v7, %v276_v9  ;;  %v283_v15 = vrot.slane %v282_v11, 4  ;;  %p649_p7 = pnand %p648_p0, %p1003_p5  ;;  %s653_s3 = scalar_lea.vmem %s652_s26, 256 }
  0x5d   : > { %p654_p10 = scmp.lt.s32.totalorder %s936_s16, %s652_s26  ;;  %p655_p12 = scmp.lt.s32.totalorder %s653_s3, %s647_s25 }
  0x5e   : > { %v233_v16 = vrot.slane %v232_v12, 2  ;;  %v239_v17 = vmax.f32 %v237_v10, %v238_v13  ;;  %v278_v18 = vrot.slane %v277_v14, 2  ;;  %v284_v19 = vmax.f32 %v282_v11, %v283_v15  ;;  %p650_p4 = pneg %p649_p7 }
  0x5f   : > { %p656_p1 = por %p655_p12, %p654_p10 }
  0x60   : > { %v234_v20 = vmax.f32 %v232_v12, %v233_v16  ;;  %v240_v21 = vrot.slane %v239_v17, 2  ;;  %v279_v22 = vmax.f32 %v277_v14, %v278_v18  ;;  %v285_v23 = vrot.slane %v284_v19, 2 }
  0x61   : > { %p657_p2 = pnand %p656_p1, %p650_p4 }
  0x62   : > { %v235_v24 = vrot.slane %v234_v20, 1  ;;  %v241_v25 = vmax.f32 %v239_v17, %v240_v21  ;;  %v280_v26 = vrot.slane %v279_v22, 1  ;;  %v286_v27 = vmax.f32 %v284_v19, %v285_v23 }
  0x64   : > { %v236_v28 = vmax.f32 %v234_v20, %v235_v24  ;;  %v242_v29 = vrot.slane %v241_v25, 1  ;;  %v281_v30 = vmax.f32 %v279_v22, %v280_v26  ;;  %v287_v31 = vrot.slane %v286_v27, 1 }
  0x66   : > { %v243_v32 = vmax.f32 %v241_v25, %v242_v29  ;;  %v288_v33 = vmax.f32 %v286_v27, %v287_v31 }
  0x68   : > { %v246_v34 = vcombine.low %v236_v28, %v243_v32  ;;  %v291_v35 = vcombine.low %v281_v30, %v288_v33 }
  0x6a   : > { %v248_v36 = vsub.f32 %v225_v3, %v246_v34  ;;  %v293_v37 = vsub.f32 %v224_v2, %v291_v35 }
  0x6c   : > { %v249_v38 = vmul.f32 1.442695, %v248_v36  ;;  %v294_v39 = vmul.f32 1.442695, %v293_v37  ;;  %v317_v40 = vsub.f32 %v248_v36, %v293_v37 }
  0x6e   : > { %571 = vpow2.f32 %v249_v38 }
  0x6f   : > { %573 = vpow2.f32 %v294_v39 }
  0x78   : > { %v572_v41 = vpop.eup %571 }
  0x79   : > { %v574_v42 = vpop.eup %573  ;;  %v252_v43 = vcombine.high %v572_v41, %v572_v41  ;;  %v254_v44 = vsel %vm229_vm0, %v572_v41, 0.0  ;;  %v318_v45 = vmul.f32 %v572_v41, %v317_v40 }
  0x7a   : > { %v255_v46 = vrot.slane %v254_v44, 4  ;;  %v297_v47 = vcombine.high %v574_v42, %v574_v42  ;;  %v299_v48 = vsel %vm229_vm0, %v574_v42, 0.0 }
  0x7b   : > { %v261_v49 = vsel %vm229_vm0, %v252_v43, 0.0  ;;  %v300_v50 = vrot.slane %v299_v48, 4  ;;  %v320_v51 = vcombine.high %v318_v45, %v318_v45  ;;  %v322_v52 = vsel %vm229_vm0, %v318_v45, 0.0 }
  0x7c   : > { %v256_v53 = vadd.f32 %v255_v46, %v254_v44  ;;  %v262_v54 = vrot.slane %v261_v49, 4  ;;  %v306_v55 = vsel %vm229_vm0, %v297_v47, 0.0  ;;  %v323_v58 = vrot.slane %v322_v52, 4 }
  0x7d   : > { %v301_v56 = vadd.f32 %v300_v50, %v299_v48  ;;  %v307_v57 = vrot.slane %v306_v55, 4  ;;  %v329_v59 = vsel %vm229_vm0, %v320_v51, 0.0 }
  0x7e   : > { %v257_v60 = vrot.slane %v256_v53, 2  ;;  %v263_v61 = vadd.f32 %v262_v54, %v261_v49  ;;  %v330_v62 = vrot.slane %v329_v59, 4  ;;  %v324_v5 = vadd.f32 %v323_v58, %v322_v52 }
  0x7f   : > { %v302_v63 = vrot.slane %v301_v56, 2  ;;  %v308_v0 = vadd.f32 %v307_v57, %v306_v55 }
  0x80   : > { %v258_v1 = vadd.f32 %v257_v60, %v256_v53  ;;  %v264_v2 = vrot.slane %v263_v61, 2  ;;  %v331_v8 = vadd.f32 %v330_v62, %v329_v59  ;;  %v325_v15 = vrot.slane %v324_v5, 2 }
  0x81   : > { %v303_v3 = vadd.f32 %v302_v63, %v301_v56  ;;  %v309_v4 = vrot.slane %v308_v0, 2 }
  0x82   : > { %v259_v6 = vrot.slane %v258_v1, 1  ;;  %v265_v7 = vadd.f32 %v264_v2, %v263_v61  ;;  %v332_v17 = vrot.slane %v331_v8, 2  ;;  %v326_v19 = vadd.f32 %v325_v15, %v324_v5 }
  0x83   : > { %v304_v9 = vrot.slane %v303_v3, 1  ;;  %v310_v10 = vadd.f32 %v309_v4, %v308_v0 }
  0x84   : > { %v260_v11 = vadd.f32 %v259_v6, %v258_v1  ;;  %v266_v12 = vrot.slane %v265_v7, 1  ;;  %v333_v20 = vadd.f32 %v332_v17, %v331_v8  ;;  %v327_v21 = vrot.slane %v326_v19, 1 }
  0x85   : > { %v305_v13 = vadd.f32 %v304_v9, %v303_v3  ;;  %v311_v14 = vrot.slane %v310_v10, 1 }
  0x86   : > { %v267_v16 = vadd.f32 %v266_v12, %v265_v7  ;;  %575 = vlog2.f32 %v260_v11  ;;  %v334_v22 = vrot.slane %v333_v20, 1  ;;  %v328_v26 = vadd.f32 %v327_v21, %v326_v19 }
  0x87   : > { %v312_v18 = vadd.f32 %v311_v14, %v310_v10  ;;  %577 = vlog2.f32 %v305_v13 }
  0x88   : > { %579 = vlog2.f32 %v267_v16  ;;  %v335_v29 = vadd.f32 %v334_v22, %v333_v20 }
  0x89   : > { %581 = vlog2.f32 %v312_v18 }
  0x8a   : > { %583 = vrcp.f32 %v260_v11 }
  0x8b   : > { %585 = vrcp.f32 %v267_v16 }
  0x90   : > { %v576_v23 = vpop.eup %575 }
  0x91   : > { %v578_v24 = vpop.eup %577  ;;  %v269_v25 = vmul.f32 0.6931472, %v576_v23 }
  0x92   : > { %v580_v27 = vpop.eup %579  ;;  %v314_v28 = vmul.f32 0.6931472, %v578_v24 }
  0x93   : > { %v582_v30 = vpop.eup %581  ;;  %v271_v31 = vmul.f32 0.6931472, %v580_v27 }
  0x94   : > { %v584_v32 = vpop.eup %583  ;;  %v316_v33 = vmul.f32 0.6931472, %v582_v30  ;;  %v340_v34 = vsub.f32 %v314_v28, %v269_v25 }
  0x95   : > { %v586_v35 = vpop.eup %585  ;;  %v338_v36 = vmul.f32 %v584_v32, %v328_v26 }
  0x96   : > { %v339_v37 = vmul.f32 %v586_v35, %v335_v29  ;;  %v341_v38 = vsub.f32 %v316_v33, %v271_v31 }
  0x97   : > { %v342_v39 = vadd.f32 %v340_v34, %v338_v36 }
  0x98   : > { %v343_v40 = vadd.f32 %v341_v38, %v339_v37 }
  0x99   : > { %v345_v41 = vsel %vm344_vm1, %v342_v39, 0.0 }
  0x9a   : > { %v346_v42 = vsel %vm344_vm1, %v343_v40, 0.0 }
  0x9b   : > { %v347_v43 = vadd.f32 %v346_v42, %v345_v41 }
  0x9d   : > { %348 = vadd.xlane.f32.xlu0 %v347_v43 }
 0x12a   : > { %v349_v44 = vpop.xlane.xlu0 %348 }
 0x12b   : > { %v350_v45 = vrot.slane %v349_v44, 4 }
 0x12d   : > { %v351_v46 = vadd.f32 %v350_v45, %v349_v44 }
 0x12f   : > { %v352_v47 = vrot.slane %v351_v46, 2 }
 0x131   : > { %v353_v48 = vadd.f32 %v352_v47, %v351_v46 }
 0x133   : > { %v354_v49 = vrot.slane %v353_v48, 1 }
 0x135   : > { %v355_v50 = vadd.f32 %v354_v49, %v353_v48 }
 0x137   : > { %502 = vpush %v355_v50 }
 0x168   : > { %s503_s30 = spop %502 }
 0x169   : > { %v357_v51 = vstv %s503_s30 }
 0x16a   : > { %358 = vst [vmem:[%s219_s21] sm:$0xff] %v357_v51 }
 0x16b   : > { %660 = shalt.err (!%p657_p2)
}
 0x16c   : > { %s661_s8 = scalar_lea.hbm %s941_s28, 128  ;;  %s665_s4 = scalar_lea.hbm %s990_s2, 256 }
 0x16d   : > { %p662_p9 = scmp.ne.s32.totalorder %s941_s28, %s661_s8  ;;  %p666_p6 = scmp.lt.u32.totalorder %s941_s28, %s990_s2 }
 0x16e   : > { %p667_p13 = scmp.lt.u32.totalorder %s665_s4, %s661_s8  ;;  %p669_p0 = scmp.lt.u32.totalorder %s661_s8, %s941_s28 }
 0x16f   : > { %p663_p11 = pnand %p662_p9, %p1003_p5 }
 0x170   : > { %p668_p8 = por %p667_p13, %p666_p6 }
 0x171   : > { %p664_p3 = pneg %p663_p11 }
 0x172   : > { %p670_p7 = por %p669_p0, %p668_p8 }
 0x174   : > { %p671_p4 = pnand %p670_p7, %p664_p3 }
 0x176   : > { %674 = shalt.err (!%p671_p4)
}
 0x177   : > { %508 = dma.vmem_to_hbm [thread:$0]  (%p1003_p5), %s936_s16, 128, %s941_s28, %s360_s29  }
 0x178 PF: > { %s386_s7 = sand.u32 1, %s713_s9   ;;  %p1004_p10 = scmp.ne.s32.totalorder %s996_s24, 0 }
 0x179   : > { %p1005_p12 = scmp.ge.s32.totalorder %s733_s14, 2  ;;  %s387_s21 = scalar_lea.sflag [#allocation4], %s386_s7 }
 0x17b   : > { %p518_p1 = pnand %p1005_p12, %p1004_p10 }
 0x17d   : > { %708 = dma.done.wait (!%p518_p1), %s387_s21, 128  }
 0x17e   : > { %710 = vsyncadd (!%p518_p1), %s387_s21, 4294967168  ;;  %s21_s14 = sadd.s32 1, %s733_s14   ;;  %s1006_s9 = smov %s717_s10 }
 0x17f   : > { %p18_p2 = scmp.ge.s32.totalorder %s21_s14, 4   ;;  %s1007_s10 = smov %s721_s11 }
 0x180   : > { %s1008_s11 = smov %s809_s23  ;;  %s1009_s12 = smov %s729_s13 }
 0x181   : > { %s1010_s13 = smov %s1012_s17  ;;  %20 = sbr.rel (!%p18_p2) target bundleno = 8 (0x8), region = 86 }
 0x188   :  { %392 = vsyncpa [#allocation3], 1 }
 0x189   :  { %394 = vsyncpa [#allocation3 + $0x1], 1 }
 0x18a   :  { %395 = vsyncpa [#allocation6], 1 }
 0x18b   :  { %397 = vsyncpa [#allocation6 + $0x1], 1 }
 0x18c   :  { %398 = vsyncpa [#allocation4], 1 }
 0x18d   :  { %400 = vsyncpa [#allocation4 + $0x1], 1 }

</bundles_post_ra>
